<compile_context>
chip_gen: v7x
topology: tpu7x:2x2x1
jax: 0.10.0
libtpu: 0.0.40
codegen_flags: <defaults>
</compile_context>

<pallas_src>
import jax
import jax.numpy as jnp
from jax import lax
from jax.experimental import pallas as pl
from jax.experimental.pallas import tpu as pltpu

_LANES = 128
_MAX_ROWS_PER_BLOCK = 1024   # (2,1024,128)+(1024,128) f32 = 1.5 MiB per buffer


def _round_up(a, b):
    return ((a + b - 1) // b) * b


def _potential_field_kernel(x_ref, o_ref):
    # x_ref: (2, TR, 128) component-major (SoA), lane-dense.
    x1 = x_ref[0]
    x2 = x_ref[1]
    rsq = x1 * x1 + x2 * x2            # r^2        (VPU)
    inv_r = lax.rsqrt(rsq)             # 1 / r      (single EUP op; no sqrt+div)
    # 1/r + r  ==  inv_r + rsq * inv_r
    o_ref[...] = inv_r + rsq * inv_r


def simple_potential_field(x):
    """x: array of shape [..., 2]; returns [..., 1] (same as PyTorch forward)."""
    lead_shape = x.shape[:-1]
    n = 1
    for s in lead_shape:
        n *= s

    orig_dtype = x.dtype
    xf = x.reshape(n, 2).astype(jnp.float32)

    rows = max(1, -(-n // _LANES))
    if rows >= _MAX_ROWS_PER_BLOCK:
        tr = _MAX_ROWS_PER_BLOCK
    else:
        tr = _round_up(rows, 8)
    rows_padded = _round_up(rows, tr)
    n_padded = rows_padded * _LANES

    pad = n_padded - n
    if pad:
        # Pad with 1.0 so the padded lanes stay finite (discarded below).
        xf = jnp.concatenate([xf, jnp.ones((pad, 2), jnp.float32)], axis=0)

    # Single AoS->SoA layout change; kernel sees lane-dense component slabs.
    xt = xf.T.reshape(2, rows_padded, _LANES)

    grid = (rows_padded // tr,)
    out = pl.pallas_call(
        _potential_field_kernel,
        out_shape=jax.ShapeDtypeStruct((rows_padded, _LANES), jnp.float32),
        grid=grid,
        in_specs=[pl.BlockSpec((2, tr, _LANES), lambda i: (0, i, 0))],
        out_specs=pl.BlockSpec((tr, _LANES), lambda i: (i, 0)),
        compiler_params=pltpu.CompilerParams(
            dimension_semantics=("parallel",)),
    )(xt)

    # NOTE: 1/r is inf for zero-norm points, matching the PyTorch module
    # (no epsilon clamp is applied, by design).
    res = out.reshape(n_padded)[:n].reshape(lead_shape + (1,))
    return res.astype(orig_dtype)


def _reference(x):
    r = jnp.linalg.norm(x, axis=-1, keepdims=True)
    return 1.0 / r + r


if __name__ == "__main__":
    key = jax.random.PRNGKey(0)
    # batch=2, seq=64 points, 2 coords (shifted so r stays away from 0)
    x = jax.random.normal(key, (2, 64, 2), dtype=jnp.float32) + 0.5

    y = simple_potential_field(x)
    jax.block_until_ready(y)

    y_ref = _reference(x)
    assert y.shape == (2, 64, 1), y.shape
    assert jnp.allclose(y, y_ref, rtol=1e-5, atol=1e-5), float(jnp.max(jnp.abs(y - y_ref)))

    print("KERNEL_OK")
</pallas_src>

<mosaic_0001>
module attributes {stable_mosaic.version = 11 : i64} {
  func.func @_potential_field_kernel(%arg0: i32, %arg1: memref<2x8x128xf32, #tpu.memory_space<vmem>>, %arg2: memref<8x128xf32, #tpu.memory_space<vmem>>) attributes {dimension_semantics = [#tpu.dimension_semantics<parallel>], iteration_bounds = array<i64: 1>, scalar_prefetch = 0 : i64, scratch_operands = 0 : i64, tpu.core_type = #tpu.core_type<tc>, window_params = [{transform_indices = @transform_0, window_bounds = array<i64: 2, 8, 128>}, {transform_indices = @transform_1, window_bounds = array<i64: 8, 128>}]} {
    %c0 = arith.constant 0 : index
    %c0_0 = arith.constant 0 : index
    %c0_1 = arith.constant 0 : index
    %0 = vector.load %arg1[%c0, %c0_0, %c0_1] : memref<2x8x128xf32, #tpu.memory_space<vmem>>, vector<1x8x128xf32>
    %1 = vector.shape_cast %0 : vector<1x8x128xf32> to vector<8x128xf32>
    %c1 = arith.constant 1 : index
    %c0_2 = arith.constant 0 : index
    %c0_3 = arith.constant 0 : index
    %2 = vector.load %arg1[%c1, %c0_2, %c0_3] : memref<2x8x128xf32, #tpu.memory_space<vmem>>, vector<1x8x128xf32>
    %3 = vector.shape_cast %2 : vector<1x8x128xf32> to vector<8x128xf32>
    %4 = arith.mulf %1, %1 : vector<8x128xf32>
    %5 = arith.mulf %3, %3 : vector<8x128xf32>
    %6 = arith.addf %4, %5 : vector<8x128xf32>
    %7 = math.rsqrt %6 : vector<8x128xf32>
    %8 = arith.mulf %6, %7 : vector<8x128xf32>
    %9 = arith.addf %7, %8 : vector<8x128xf32>
    %c0_4 = arith.constant 0 : index
    %c0_5 = arith.constant 0 : index
    %10 = vector.load %arg2[%c0_4, %c0_5] : memref<8x128xf32, #tpu.memory_space<vmem>>, vector<8x128xf32>
    tpu.vector_store %arg2[%c0_4, %c0_5], %9 {strides = array<i32>} : memref<8x128xf32, #tpu.memory_space<vmem>>, vector<8x128xf32>,
    return
  }
  func.func @transform_0(%arg0: i32) -> (i32, i32, i32) {
    %c0_i32 = arith.constant 0 : i32
    %c0_i32_0 = arith.constant 0 : i32
    %c0_i32_1 = arith.constant 0 : i32
    return %c0_i32, %arg0, %c0_i32_0 : i32, i32, i32
  }
  func.func @transform_1(%arg0: i32) -> (i32, i32) {
    %c0_i32 = arith.constant 0 : i32
    %c0_i32_0 = arith.constant 0 : i32
    return %arg0, %c0_i32 : i32, i32
  }
}

</mosaic_0001>

<bundles_post_ra>
// kernel: tpu_custom_call.1
= control target key start
LH: loop header
LB: loop body
LE: loop exit
PB: predicated region body
PF: predicated region fallthrough
CT: control target
= control target key end

     0   :  { %6 = vsyncpa [#allocation3], 0  ;;  %s140_s0 = inlined_call_operand.hbm [shape: f32[2,8,128], index: 0, kind: input, shape index: {}]   ;;  %s141_s1 = inlined_call_operand.hbm [shape: f32[8,128], index: 1, kind: output, shape index: {}]  }
   0x1   :  { %7 = vsyncpa [#allocation4], 0  ;;  %s102_s6 = smov [#allocation2]   ;;  %s54_s10 = scalar_lea.hbm %s140_s0, 256 }
   0x2   :  { %s13_s7 = sshll.u32 %s102_s6, 4  ;;  %p55_p0 = scmp.ne.s32.totalorder %s140_s0, %s54_s10  ;;  %s14_s7 = int_to_ptr.vmem [resolvable:$true] %s13_s7 }
   0x3   :  { %p58_p1 = scmp.lt.u32.totalorder %s54_s10, %s140_s0 }
   0x5   :  { %p60_p2 = pnand %p58_p1, %p55_p0 }
   0x7   :  { %63 = shalt.err (!%p60_p2)
}
   0x8   :  { %s64_s15 = scalar_lea.vmem %s14_s7, 256  ;;  %p69_p4 = scmp.lt.s32.totalorder %s14_s7, %s14_s7 }
   0x9   :  { %p65_p3 = scmp.ne.s32.totalorder %s14_s7, %s64_s15  ;;  %p70_p5 = scmp.lt.s32.totalorder %s64_s15, %s64_s15 }
   0xb   :  { %p71_p6 = por %p70_p5, %p69_p4 }
   0xd   :  { %p72_p7 = pnand %p71_p6, %p65_p3 }
   0xf   :  { %75 = shalt.err (!%p72_p7)
}
  0x10   :  { %s103_s16 = smov 128   ;;  %s104_s17 = smov 8  }
  0x11   :  { %19 = dma.hbm_to_vmem [thread:$0]  %s140_s0, 256, %s14_s7, [#allocation3], %s103_s16, %s103_s16, %s104_s17  }
  0x12   :  { %98 = dma.done.wait [#allocation3], 256  }
  0x13   :  { %99 = vsyncadd [#allocation3], 4294967040  ;;  %v23_v0 = vld [vmem:[#allocation2] sm:$0xff]  ;;  %v25_v1 = vld [vmem:[#allocation2 + $0x8] sm:$0xff]  ;;  %s105_s20 = smov [#allocation5]  }
  0x14   :  { %v26_v2 = vmul.f32 %v23_v0, %v23_v0  ;;  %v27_v3 = vmul.f32 %v25_v1, %v25_v1  ;;  %s39_s21 = sshll.u32 %s105_s20, 4  ;;  %s40_s21 = int_to_ptr.vmem [resolvable:$true] %s39_s21 }
  0x15   :  { %s76_s22 = scalar_lea.vmem %s40_s21, 128  ;;  %p81_p9 = scmp.lt.s32.totalorder %s40_s21, %s40_s21 }
  0x16   :  { %v28_v4 = vadd.f32 %v27_v3, %v26_v2  ;;  %p77_p8 = scmp.ne.s32.totalorder %s40_s21, %s76_s22  ;;  %p82_p10 = scmp.lt.s32.totalorder %s76_s22, %s76_s22 }
  0x18   :  { %52 = vrsqrt.f32 %v28_v4  ;;  %p83_p11 = por %p82_p10, %p81_p9 }
  0x1a   :  { %p84_p12 = pnand %p83_p11, %p77_p8 }
  0x22   :  { %v53_v5 = vpop.eup %52 }
  0x23   :  { %v30_v6 = vmul.f32 %v53_v5, %v28_v4 }
  0x25   :  { %v31_v7 = vadd.f32 %v53_v5, %v30_v6 }
  0x27   :  { %32 = vst [vmem:[#allocation5] sm:$0xff] %v31_v7 }
  0x28   :  { %87 = shalt.err (!%p84_p12)
}
  0x29   :  { %s88_s24 = scalar_lea.hbm %s141_s1, 128 }
  0x2a   :  { %p89_p13 = scmp.ne.s32.totalorder %s141_s1, %s88_s24  ;;  %p92_p0 = scmp.lt.u32.totalorder %s88_s24, %s141_s1 }
  0x2c   :  { %p94_p1 = pnand %p92_p0, %p89_p13 }
  0x2e   :  { %97 = shalt.err (!%p94_p1)
}
  0x2f   :  { %42 = dma.vmem_to_hbm [thread:$0]  %s40_s21, 128, %s141_s1, [#allocation4]  }
  0x30   :  { %100 = dma.done.wait [#allocation4], 128  }
  0x31   :  { %101 = vsyncadd [#allocation4], 4294967168 }
  0x32   :  { %46 = vsyncpa [#allocation3], 1 }
  0x33   :  { %47 = vsyncpa [#allocation4], 1 }

</bundles_post_ra>
